<compile_context>
chip_gen: v5e
topology: v5e:2x2
jax: 0.10.0
libtpu: 0.0.40
codegen_flags: <defaults>
</compile_context>

<pallas_src>
import jax
import jax.numpy as jnp
from jax.experimental import pallas as pl
from jax.experimental.pallas import tpu as pltpu

_LANE = 128
_SUBLANE_MULT = 32                 # layout-clean for f32 / bf16 / int8
_BLOCK_BYTES = 4 * 1024 * 1024     # 4 MiB block; 4x (double-buffered in+out) = 16 MiB
_VMEM_LIMIT = 32 * 1024 * 1024     # explicit scoped VMEM limit (fits v5e/v6e/v7x)


def _identity_kernel(x_ref, o_ref):
    # Whole-tile VMEM copy (identity forward).
    o_ref[...] = x_ref[...]


def _choose_cols(m):
    """Pick cols = 128*k with k the largest divisor of m, k <= 64 (cols <= 8192)."""
    for k in range(min(64, m), 0, -1):
        if m % k == 0:
            return _LANE * k, m // k
    return _LANE, m


def _pallas_identity_flat(flat):
    """Identity copy of a flat 1D array whose length is a multiple of 128."""
    total = flat.shape[0]
    itemsize = jnp.dtype(flat.dtype).itemsize
    m = total // _LANE
    cols, rows = _choose_cols(m)

    max_block_rows = max(1, _BLOCK_BYTES // (cols * itemsize))
    if rows <= max_block_rows:
        # Single full-array block: one DMA in / one out, zero grid-step overhead.
        tile_rows = rows
        pad_rows = 0
    else:
        tile_rows = max(_SUBLANE_MULT,
                        (max_block_rows // _SUBLANE_MULT) * _SUBLANE_MULT)
        pad_rows = (-rows) % tile_rows

    if pad_rows:
        flat = jnp.pad(flat, (0, pad_rows * cols))
        rows = rows + pad_rows

    x2d = flat.reshape(rows, cols)
    grid = (rows // tile_rows,)

    out2d = pl.pallas_call(
        _identity_kernel,
        out_shape=jax.ShapeDtypeStruct((rows, cols), x2d.dtype),
        grid_spec=pltpu.PrefetchScalarGridSpec(
            num_scalar_prefetch=0,
            grid=grid,
            in_specs=[pl.BlockSpec((tile_rows, cols), lambda i: (i, 0))],
            out_specs=pl.BlockSpec((tile_rows, cols), lambda i: (i, 0)),
        ),
        input_output_aliases={0: 0},
        compiler_params=pltpu.CompilerParams(
            dimension_semantics=("parallel",),
            vmem_limit_bytes=_VMEM_LIMIT,
        ),
        cost_estimate=pl.CostEstimate(
            flops=0,
            transcendentals=0,
            bytes_accessed=2 * rows * cols * itemsize,
        ),
    )(x2d)

    out_flat = out2d.reshape(rows * cols)
    if pad_rows:
        out_flat = out_flat[:total]
    return out_flat


class BaseModel:
    """JAX/Pallas port of the PyTorch BaseModel (abstract base).

    Only the tensor-facing pieces are reproduced; checkpoint I/O and optimizer
    plumbing have no Pallas equivalent and are intentionally omitted.
    """

    def __init__(self):
        self.model_names = []
        self.input = None
        self._output = None
        self.opt = None

    def init(self, opt=None):
        # No parameters to create — the reference __init__ defines none.
        self.opt = opt
        self.model_names = []

    def setInput(self, x):
        self.input = x

    def forward(self):
        # Reference forward() is `pass`.  We run the stored input through a
        # Pallas identity kernel so the data path exercises TPU HBM<->VMEM.
        if self.input is None:
            return None
        x = self.input
        orig_shape = x.shape
        total = int(x.size)
        if total == 0:
            self._output = x
            return self._output

        flat = x.reshape(total)
        lane_pad = (-total) % _LANE
        if lane_pad:
            flat = jnp.pad(flat, (0, lane_pad))

        out_flat = _pallas_identity_flat(flat)
        if lane_pad:
            out_flat = out_flat[:total]

        self._output = out_flat.reshape(orig_shape)
        return self._output

    def test(self):
        # torch.no_grad() has no analogue needed here (no autodiff requested).
        return self.forward()

    # Training / IO scaffolding with no kernel content.
    def optimize_parameters(self):
        pass

    def get_current_visuals(self):
        pass

    def get_current_losses(self):
        pass

    def update_learning_rate(self):
        pass


if __name__ == "__main__":
    key = jax.random.PRNGKey(0)

    # NCHW input, PyTorch convention: batch=2, channels=4, spatial=16x16.
    x = jax.random.normal(key, (2, 4, 16, 16), dtype=jnp.float32)

    model = BaseModel()
    model.init(opt=None)
    model.setInput(x)
    y = model.test()
    y = jax.block_until_ready(y)
    assert y.shape == x.shape and y.dtype == x.dtype
    assert bool(jnp.all(y == x))

    # Exercise the non-128-multiple / padding path with a tiny odd-sized input.
    x2 = jax.random.normal(jax.random.PRNGKey(1), (3, 5, 7), dtype=jnp.bfloat16)
    model.setInput(x2)
    y2 = jax.block_until_ready(model.test())
    assert y2.shape == x2.shape and y2.dtype == x2.dtype
    assert bool(jnp.all(y2 == x2))

    print("KERNEL_OK")
</pallas_src>

<mosaic_0001>
module attributes {stable_mosaic.version = 11 : i64} {
  func.func @_identity_kernel(%arg0: i32, %arg1: memref<1x2048xf32, #tpu.memory_space<vmem>>, %arg2: memref<1x2048xf32, #tpu.memory_space<vmem>>) attributes {dimension_semantics = [#tpu.dimension_semantics<parallel>], iteration_bounds = array<i64: 1>, scalar_prefetch = 0 : i64, scratch_operands = 0 : i64, tpu.core_type = #tpu.core_type<tc>, window_params = [{transform_indices = @transform_0, window_bounds = array<i64: 1, 2048>}, {transform_indices = @transform_1, window_bounds = array<i64: 1, 2048>}]} {
    %c0 = arith.constant 0 : index
    %c0_0 = arith.constant 0 : index
    %0 = vector.load %arg1[%c0, %c0_0] : memref<1x2048xf32, #tpu.memory_space<vmem>>, vector<1x2048xf32>
    %c0_1 = arith.constant 0 : index
    %c0_2 = arith.constant 0 : index
    %1 = vector.load %arg2[%c0_1, %c0_2] : memref<1x2048xf32, #tpu.memory_space<vmem>>, vector<1x2048xf32>
    tpu.vector_store %arg2[%c0_1, %c0_2], %0 {strides = array<i32>} : memref<1x2048xf32, #tpu.memory_space<vmem>>, vector<1x2048xf32>,
    return
  }
  func.func @transform_0(%arg0: i32) -> (i32, i32) {
    %c0_i32 = arith.constant 0 : i32
    %c0_i32_0 = arith.constant 0 : i32
    return %arg0, %c0_i32 : i32, i32
  }
  func.func @transform_1(%arg0: i32) -> (i32, i32) {
    %c0_i32 = arith.constant 0 : i32
    %c0_i32_0 = arith.constant 0 : i32
    return %arg0, %c0_i32 : i32, i32
  }
}

</mosaic_0001>

<bundles_post_ra>
// kernel: tpu_custom_call.1
= control target key start
LH: loop header
LB: loop body
LE: loop exit
PB: predicated region body
PF: predicated region fallthrough
CT: control target
= control target key end

     0   :  { %6 = vsyncpa [#allocation3], 0  ;;  %s116_s0 = inlined_call_operand.hbm [shape: f32[1,2048], index: 0, kind: input, shape index: {}, may-alias: {0,1}]   ;;  %s117_s1 = inlined_call_operand.hbm [shape: f32[1,2048], index: 1, kind: output, shape index: {}, may-alias: {0,1}]  }
   0x1   :  { %7 = vsyncpa [#allocation4], 0  ;;  %s13_s8 = sshll.u32 %s116_s0, 4  ;;  %s98_s9 = smov [#allocation2]   ;;  %s14_s8 = int_to_ptr.hbm [resolvable:$true] %s13_s8 }
   0x2   :  { %s15_s10 = sshll.u32 %s98_s9, 4  ;;  %s16_s10 = int_to_ptr.vmem [resolvable:$true] %s15_s10 }
   0x3   :  { %18 = dma.hbm_to_vmem [thread:$0]  %s14_s8, 256, %s16_s10, [#allocation3]  }
   0x4   :  { %94 = dma.done.wait [#allocation3], 256  }
   0x5   :  { %95 = vsyncadd [#allocation3], 4294967040  ;;  %s99_s11 = smov [#allocation5]   ;;  %s34_s15 = sshll.u32 %s117_s1, 4  ;;  %v23_v0 = vld [vmem:[#allocation2] sm:$0xff]  ;;  %v24_v1 = vld [vmem:[#allocation2 + $0x8] sm:$0xff]  ;;  %s35_s15 = int_to_ptr.hbm [resolvable:$true] %s34_s15 }
   0x6   :  { %s32_s12 = sshll.u32 %s99_s11, 4  ;;  %25 = vst [vmem:[#allocation5] sm:$0xff] %v23_v0  ;;  %s33_s12 = int_to_ptr.vmem [resolvable:$true] %s32_s12 }
   0x7   :  { %26 = vst [vmem:[#allocation5 + $0x8] sm:$0xff] %v24_v1 }
   0x8   :  { %37 = dma.vmem_to_hbm [thread:$0]  %s33_s12, 256, %s35_s15, [#allocation4]  }
   0x9   :  { %96 = dma.done.wait [#allocation4], 256  }
   0xa   :  { %97 = vsyncadd [#allocation4], 4294967040 }
   0xb   :  { %42 = vsyncpa [#allocation3], 1 }
   0xc   :  { %43 = vsyncpa [#allocation4], 1 }

</bundles_post_ra>
